<compile_context>
chip_gen: v6e
topology: v6e:2x2x1
jax: 0.10.0
libtpu: 0.0.40
codegen_flags: <defaults>
</compile_context>

<pallas_src>
import jax
import jax.numpy as jnp
from jax import lax
from jax.experimental import pallas as pl
from jax.experimental.pallas import tpu as pltpu


def _make_kernel(tb, seq_len, vocab):
    """Kernel for one batch tile of `tb` rows, each `seq_len` tokens."""
    inv_s = 1.0 / float(seq_len)

    def kernel(ids_ref, tab_ref, b_ref, out_ref):
        # ids_ref : VMEM (tb, S)     int32  -- token ids of this batch tile
        # tab_ref : VMEM (V, n_out)  f32    -- projected table  E @ W^T
        # b_ref   : VMEM (1, n_out)  f32    -- linear bias
        # out_ref : VMEM (tb, n_out) f32    -- output tile
        ids = ids_ref[...]                                          # (tb, S)

        # 3-D one-hot over the vocab (lane) axis; OOB ids -> all-zero row.
        v_iota = lax.broadcasted_iota(jnp.int32, (tb, seq_len, vocab), 2)
        one_hot = (ids[:, :, None] == v_iota).astype(jnp.float32)   # (tb, S, V)

        # counts[b, v] = (# occurrences of v in row b) / S   (sublane reduce)
        counts = one_hot.sum(axis=1) * inv_s                        # (tb, V)

        # mean-embedding + linear in one matmul against the folded table.
        out = jnp.dot(counts, tab_ref[...],
                      preferred_element_type=jnp.float32) + b_ref[...]
        out_ref[...] = out.astype(out_ref.dtype)

    return kernel


def simple_linear_model(token_ids, embedding_matrix, linear_weight, linear_bias):
    """token_ids: (B, S) int; embedding_matrix: (V, D); linear_weight: (n_out, D);
    linear_bias: (n_out,).  Returns (B, n_out) float32 matching the PyTorch forward."""
    B, S = token_ids.shape
    V, D = embedding_matrix.shape
    n_out = linear_weight.shape[0]

    # Fold the linear layer into the embedding table (model is fully linear):
    #   mean_emb @ W^T + b  ==  counts @ (E @ W^T) + b
    table = (embedding_matrix.astype(jnp.float32)
             @ linear_weight.astype(jnp.float32).T)                 # (V, n_out)
    bias2d = linear_bias.astype(jnp.float32).reshape(1, n_out)
    ids = token_ids.astype(jnp.int32)                               # (B, S) lane-dense

    # Batch tile: >= 2 tiles when B is large enough (lets the "parallel" grid
    # axis shard across v7x's two TensorCores); tiles stay a multiple of 8
    # sublanes.  For small B a single full-batch tile is used.
    if B >= 16 and B % 8 == 0:
        tb = min(128, max(8, ((B // 2 + 7) // 8) * 8))
    else:
        tb = min(B, 128)
    n_tiles = pl.cdiv(B, tb)

    kernel = _make_kernel(tb, S, V)

    def build(single_buffer_consts):
        const_kw = ({"pipeline_mode": pl.Buffered(1)}
                    if single_buffer_consts else {})
        return pl.pallas_call(
            kernel,
            out_shape=jax.ShapeDtypeStruct((B, n_out), jnp.float32),
            grid=(n_tiles,),
            in_specs=[
                pl.BlockSpec((tb, S), lambda i: (i, 0)),              # ids tile
                pl.BlockSpec((V, n_out), lambda i: (0, 0), **const_kw),  # E @ W^T
                pl.BlockSpec((1, n_out), lambda i: (0, 0), **const_kw),  # bias
            ],
            out_specs=pl.BlockSpec((tb, n_out), lambda i: (i, 0)),
            compiler_params=pltpu.CompilerParams(
                dimension_semantics=("parallel",)),
        )

    try:
        out = build(True)(ids, table, bias2d)
        return jax.block_until_ready(out)
    except Exception:
        # pipeline_mode / Buffered(1) not supported by this JAX version:
        # fall back to default double-buffering of the (tiny) constant operands.
        return build(False)(ids, table, bias2d)


if __name__ == "__main__":
    key = jax.random.PRNGKey(0)
    k_emb, k_ids, k_w, k_b = jax.random.split(key, 4)

    VOCAB, EMBED_DIM = 50, 32
    BATCH, SEQ = 2, 8

    embedding_matrix = jax.random.normal(k_emb, (VOCAB, EMBED_DIM), dtype=jnp.float32)
    token_ids = jax.random.randint(k_ids, (BATCH, SEQ), 0, VOCAB, dtype=jnp.int32)
    # nn.Linear(EMBED_DIM, 2): weight (2, EMBED_DIM), bias (2,)
    linear_weight = (jax.random.normal(k_w, (2, EMBED_DIM), dtype=jnp.float32)
                     * (1.0 / jnp.sqrt(EMBED_DIM)))
    linear_bias = jax.random.normal(k_b, (2,), dtype=jnp.float32) * 0.1

    out = simple_linear_model(token_ids, embedding_matrix, linear_weight, linear_bias)
    out = jax.block_until_ready(out)

    # Pure-JAX reference of the PyTorch forward.
    embedded = jnp.take(embedding_matrix, token_ids, axis=0)      # (B, S, D)
    ref = embedded.mean(axis=1) @ linear_weight.T + linear_bias   # (B, 2)

    assert out.shape == (BATCH, 2)
    assert jnp.allclose(out, ref, atol=1e-5, rtol=1e-5)
    print("KERNEL_OK")
</pallas_src>

<mosaic_0001>
module attributes {stable_mosaic.version = 11 : i64} {
  func.func @kernel(%arg0: i32, %arg1: memref<2x8xi32, #tpu.memory_space<vmem>>, %arg2: memref<50x2xf32, #tpu.memory_space<vmem>>, %arg3: memref<1x2xf32, #tpu.memory_space<vmem>>, %arg4: memref<2x2xf32, #tpu.memory_space<vmem>>) attributes {dimension_semantics = [#tpu.dimension_semantics<parallel>], iteration_bounds = array<i64: 1>, scalar_prefetch = 0 : i64, scratch_operands = 0 : i64, tpu.core_type = #tpu.core_type<tc>, window_params = [{transform_indices = @transform_0, window_bounds = array<i64: 2, 8>}, {pipeline_mode = #tpu.pipeline_mode<synchronous>, transform_indices = @transform_1, window_bounds = array<i64: 50, 2>}, {pipeline_mode = #tpu.pipeline_mode<synchronous>, transform_indices = @transform_2, window_bounds = array<i64: 1, 2>}, {transform_indices = @transform_3, window_bounds = array<i64: 2, 2>}]} {
    %c0 = arith.constant 0 : index
    %c0_0 = arith.constant 0 : index
    %0 = vector.load %arg1[%c0, %c0_0] : memref<2x8xi32, #tpu.memory_space<vmem>>, vector<2x8xi32>
    %1 = tpu.iota {dimensions = array<i32: 2>} : vector<2x8x50xi32>
    %2 = vector.shape_cast %0 : vector<2x8xi32> to vector<2x8x1xi32>
    %3 = vector.broadcast %2 : vector<2x8x1xi32> to vector<2x8x50xi32>
    %4 = arith.cmpi eq, %3, %1 : vector<2x8x50xi32>
    %5 = arith.extui %4 : vector<2x8x50xi1> to vector<2x8x50xi32>
    %6 = arith.sitofp %5 : vector<2x8x50xi32> to vector<2x8x50xf32>
    %cst = arith.constant dense<0.000000e+00> : vector<2x50xf32>
    %7 = vector.multi_reduction <add>, %6, %cst [1] : vector<2x8x50xf32> to vector<2x50xf32>
    %cst_1 = arith.constant 1.250000e-01 : f32
    %8 = vector.broadcast %cst_1 : f32 to vector<2x50xf32>
    %9 = arith.mulf %7, %8 : vector<2x50xf32>
    %c0_2 = arith.constant 0 : index
    %c0_3 = arith.constant 0 : index
    %10 = vector.load %arg2[%c0_2, %c0_3] : memref<50x2xf32, #tpu.memory_space<vmem>>, vector<50x2xf32>
    %cst_4 = arith.constant dense<0.000000e+00> : vector<2x2xf32>
    %11 = tpu.matmul %9, %10, %cst_4 {dimension_numbers = #tpu.dot_dimension_numbers<[1], [0], [0], [1], [0, 0, 1, 1], [], []>} : vector<2x50xf32>, vector<50x2xf32>, vector<2x2xf32> -> vector<2x2xf32>
    %c0_5 = arith.constant 0 : index
    %c0_6 = arith.constant 0 : index
    %12 = vector.load %arg3[%c0_5, %c0_6] : memref<1x2xf32, #tpu.memory_space<vmem>>, vector<1x2xf32>
    %13 = vector.broadcast %12 : vector<1x2xf32> to vector<2x2xf32>
    %14 = arith.addf %11, %13 : vector<2x2xf32>
    %c0_7 = arith.constant 0 : index
    %c0_8 = arith.constant 0 : index
    %15 = vector.load %arg4[%c0_7, %c0_8] : memref<2x2xf32, #tpu.memory_space<vmem>>, vector<2x2xf32>
    tpu.vector_store %arg4[%c0_7, %c0_8], %14 {strides = array<i32>} : memref<2x2xf32, #tpu.memory_space<vmem>>, vector<2x2xf32>,
    return
  }
  func.func @transform_0(%arg0: i32) -> (i32, i32) {
    %c0_i32 = arith.constant 0 : i32
    %c0_i32_0 = arith.constant 0 : i32
    return %arg0, %c0_i32 : i32, i32
  }
  func.func @transform_1(%arg0: i32) -> (i32, i32) {
    %c0_i32 = arith.constant 0 : i32
    %c0_i32_0 = arith.constant 0 : i32
    %c0_i32_1 = arith.constant 0 : i32
    return %c0_i32, %c0_i32_0 : i32, i32
  }
  func.func @transform_2(%arg0: i32) -> (i32, i32) {
    %c0_i32 = arith.constant 0 : i32
    %c0_i32_0 = arith.constant 0 : i32
    %c0_i32_1 = arith.constant 0 : i32
    return %c0_i32, %c0_i32_0 : i32, i32
  }
  func.func @transform_3(%arg0: i32) -> (i32, i32) {
    %c0_i32 = arith.constant 0 : i32
    %c0_i32_0 = arith.constant 0 : i32
    return %arg0, %c0_i32 : i32, i32
  }
}

module attributes {stable_mosaic.version = 11 : i64} {
  func.func @kernel(%arg0: i32, %arg1: memref<2x8xi32, #tpu.memory_space<vmem>>, %arg2: memref<50x2xf32, #tpu.memory_space<vmem>>, %arg3: memref<1x2xf32, #tpu.memory_space<vmem>>, %arg4: memref<2x2xf32, #tpu.memory_space<vmem>>) attributes {dimension_semantics = [#tpu.dimension_semantics<parallel>], iteration_bounds = array<i64: 1>, scalar_prefetch = 0 : i64, scratch_operands = 0 : i64, tpu.core_type = #tpu.core_type<tc>, window_params = [{transform_indices = @transform_0, window_bounds = array<i64: 2, 8>}, {pipeline_mode = #tpu.pipeline_mode<synchronous>, transform_indices = @transform_1, window_bounds = array<i64: 50, 2>}, {pipeline_mode = #tpu.pipeline_mode<synchronous>, transform_indices = @transform_2, window_bounds = array<i64: 1, 2>}, {transform_indices = @transform_3, window_bounds = array<i64: 2, 2>}]} {
    %c0 = arith.constant 0 : index
    %c0_0 = arith.constant 0 : index
    %0 = vector.load %arg1[%c0, %c0_0] : memref<2x8xi32, #tpu.memory_space<vmem>>, vector<2x8xi32>
    %1 = tpu.iota {dimensions = array<i32: 2>} : vector<2x8x50xi32>
    %2 = vector.shape_cast %0 : vector<2x8xi32> to vector<2x8x1xi32>
    %3 = vector.broadcast %2 : vector<2x8x1xi32> to vector<2x8x50xi32>
    %4 = arith.cmpi eq, %3, %1 : vector<2x8x50xi32>
    %5 = arith.extui %4 : vector<2x8x50xi1> to vector<2x8x50xi32>
    %6 = arith.sitofp %5 : vector<2x8x50xi32> to vector<2x8x50xf32>
    %cst = arith.constant dense<0.000000e+00> : vector<2x50xf32>
    %7 = vector.multi_reduction <add>, %6, %cst [1] : vector<2x8x50xf32> to vector<2x50xf32>
    %cst_1 = arith.constant 1.250000e-01 : f32
    %8 = vector.broadcast %cst_1 : f32 to vector<2x50xf32>
    %9 = arith.mulf %7, %8 : vector<2x50xf32>
    %c0_2 = arith.constant 0 : index
    %c0_3 = arith.constant 0 : index
    %10 = vector.load %arg2[%c0_2, %c0_3] : memref<50x2xf32, #tpu.memory_space<vmem>>, vector<50x2xf32>
    %cst_4 = arith.constant dense<0.000000e+00> : vector<2x2xf32>
    %11 = tpu.matmul %9, %10, %cst_4 {dimension_numbers = #tpu.dot_dimension_numbers<[1], [0], [0], [1], [0, 0, 1, 1], [], []>} : vector<2x50xf32>, vector<50x2xf32>, vector<2x2xf32> -> vector<2x2xf32>
    %c0_5 = arith.constant 0 : index
    %c0_6 = arith.constant 0 : index
    %12 = vector.load %arg3[%c0_5, %c0_6] : memref<1x2xf32, #tpu.memory_space<vmem>>, vector<1x2xf32>
    %13 = vector.broadcast %12 : vector<1x2xf32> to vector<2x2xf32>
    %14 = arith.addf %11, %13 : vector<2x2xf32>
    %c0_7 = arith.constant 0 : index
    %c0_8 = arith.constant 0 : index
    %15 = vector.load %arg4[%c0_7, %c0_8] : memref<2x2xf32, #tpu.memory_space<vmem>>, vector<2x2xf32>
    tpu.vector_store %arg4[%c0_7, %c0_8], %14 {strides = array<i32>} : memref<2x2xf32, #tpu.memory_space<vmem>>, vector<2x2xf32>,
    return
  }
  func.func @transform_0(%arg0: i32) -> (i32, i32) {
    %c0_i32 = arith.constant 0 : i32
    %c0_i32_0 = arith.constant 0 : i32
    return %arg0, %c0_i32 : i32, i32
  }
  func.func @transform_1(%arg0: i32) -> (i32, i32) {
    %c0_i32 = arith.constant 0 : i32
    %c0_i32_0 = arith.constant 0 : i32
    %c0_i32_1 = arith.constant 0 : i32
    return %c0_i32, %c0_i32_0 : i32, i32
  }
  func.func @transform_2(%arg0: i32) -> (i32, i32) {
    %c0_i32 = arith.constant 0 : i32
    %c0_i32_0 = arith.constant 0 : i32
    %c0_i32_1 = arith.constant 0 : i32
    return %c0_i32, %c0_i32_0 : i32, i32
  }
  func.func @transform_3(%arg0: i32) -> (i32, i32) {
    %c0_i32 = arith.constant 0 : i32
    %c0_i32_0 = arith.constant 0 : i32
    return %arg0, %c0_i32 : i32, i32
  }
}

</mosaic_0001>

<bundles_post_ra>
// kernel: tpu_custom_call.1
= control target key start
LH: loop header
LB: loop body
LE: loop exit
PB: predicated region body
PF: predicated region fallthrough
CT: control target
= control target key end

     0   :  { %v16_v0 = vlaneseq  ;;  %s276_s0 = inlined_call_operand.vmem [shape: s32[2,8], index: 0, kind: input, shape index: {}]   ;;  %s277_s1 = inlined_call_operand.vmem [shape: f32[50,2], index: 1, kind: input, shape index: {}]   ;;  %s278_s2 = inlined_call_operand.vmem [shape: f32[1,2], index: 2, kind: input, shape index: {}]   ;;  %s279_s3 = inlined_call_operand.hbm [shape: f32[2,2], index: 3, kind: output, shape index: {}]  }
   0x1   :  { %8 = vsyncpa [#allocation3], 0  ;;  %v220_v1 = vmov 0.0   ;;  %v15_v3 = vld [vmem:[%s276_s0] sm:$0x3]  ;;  %vm75_vm0 = vcmask 1041408  }
   0x2   :  { %178 = vmatprep.subr.mxu0 %v220_v1  ;;  %v19_v2 = vshrl.u32 %v16_v0, 7  ;;  %v61_v4 = vld [vmem:[%s277_s1 + $0x30] sm:$0x3]  ;;  %v60_v7 = vld [vmem:[%s277_s1 + $0x28] sm:$0xff]  ;;  %v59_v9 = vld [vmem:[%s277_s1 + $0x20] sm:$0xff]  ;;  %vm221_vm1 = vmmov 0  }
   0x3   :  { %179 = vmatpush3.msk.msra.mxu0 %vm75_vm0, %v61_v4  ;;  %v58_v11 = vld [vmem:[%s277_s1 + $0x18] sm:$0xff]  ;;  %v57_v12 = vld [vmem:[%s277_s1 + $0x10] sm:$0xff]  ;;  %v56_v13 = vld [vmem:[%s277_s1 + $0x8] sm:$0xff]  ;;  %192 = vmatprep.mubr.msk.f32.mxu0 %vm221_vm1, %v220_v1  ;;  %v17_v15 = vand.u32 127, %v16_v0  ;;  %vm38_vm2 = vcmask 408576   ;;  %vm71_vm5 = vcmask 1041409  }
   0x4   :  { %v20_v5 = vsub.s32 0, %v19_v2  ;;  %v27_v6 = vsub.s32 1, %v19_v2  ;;  %180 = vmatprep.subr.mxu0 %v220_v1  ;;  %v55_v14 = vld [vmem:[%s277_s1] sm:$0xff]  ;;  %s222_s28 = smov [#allocation2]   ;;  %vm149_vm6 = vcmask 9216  }
   0x5   :  { %181 = vmatpush3.msra.mxu0 %v60_v7  ;;  %v167_v37 = vld [vmem:[%s278_s2] ss:$0 sm:$0xff]  ;;  %s157_s29 = sshll.u32 %s222_s28, 4  ;;  %s158_s29 = int_to_ptr.vmem [resolvable:$true] %s157_s29 }
   0x6   :  { %v21_v8 = vrot.slane %v15_v3, %v20_v5  ;;  %182 = vmatprep.subr.mxu0 %v220_v1  ;;  %v28_v10 = vrot.slane %v15_v3, %v27_v6  ;;  %s198_s30 = scalar_lea.vmem %s158_s29, 32  ;;  %p203_p1 = scmp.lt.s32.totalorder %s158_s29, %s158_s29 }
   0x7   :  { %183 = vmatpush3.msra.mxu0 %v59_v9  ;;  %p199_p0 = scmp.ne.s32.totalorder %s158_s29, %s198_s30  ;;  %p204_p2 = scmp.lt.s32.totalorder %s198_s30, %s198_s30 }
   0x8   :  { %23 = vbcast.lane.b32.xlu0 %v21_v8, 256  ;;  %184 = vmatprep.subr.mxu0 %v220_v1 }
   0x9   :  { %185 = vmatpush3.msra.mxu0 %v58_v11  ;;  %p205_p3 = por %p204_p2, %p203_p1 }
   0xa   :  { %186 = vmatprep.subr.mxu0 %v220_v1 }
   0xb   :  { %187 = vmatpush3.msra.mxu0 %v57_v12  ;;  %p206_p4 = pnand %p205_p3, %p199_p0 }
   0xc   :  { %30 = vbcast.lane.b32.xlu0 %v28_v10, 256  ;;  %188 = vmatprep.subr.mxu0 %v220_v1 }
   0xd   :  { %189 = vmatpush3.msra.mxu0 %v56_v13 }
   0xe   :  { %190 = vmatprep.subr.mxu0 %v220_v1 }
   0xf   :  { %191 = vmatpush3.msra.mxu0 %v55_v14 }
  0x7a   :  { %v24_v16 = vpop.permute.xlu0 %23 }
  0x7b   :  { %vm32_vm3 = vcmp.eq.s32.totalorder %v24_v16, %v17_v15 }
  0x7c   :  { %v165_v17 = vsel %vm32_vm3, 1.0, %v220_v1 }
  0x7d   :  { %v39_v18 = vsel %vm38_vm2, %v165_v17, 0.0 }
  0x7e   :  { %v40_v19 = vrot.slane %v39_v18, 4  ;;  %v31_v20 = vpop.permute.xlu0 %30 }
  0x7f   :  { %vm33_vm4 = vcmp.eq.s32.totalorder %v31_v20, %v17_v15 }
  0x80   :  { %v41_v21 = vadd.f32 %v40_v19, %v39_v18  ;;  %v166_v22 = vsel %vm33_vm4, 1.0, %v220_v1 }
  0x81   :  { %v46_v23 = vsel %vm38_vm2, %v166_v22, 0.0 }
  0x82   :  { %v42_v24 = vrot.slane %v41_v21, 2  ;;  %v47_v25 = vrot.slane %v46_v23, 4 }
  0x84   :  { %v43_v26 = vadd.f32 %v42_v24, %v41_v21  ;;  %v48_v27 = vadd.f32 %v47_v25, %v46_v23 }
  0x86   :  { %v44_v28 = vrot.slane %v43_v26, 1  ;;  %v49_v29 = vrot.slane %v48_v27, 2 }
  0x88   :  { %v50_v30 = vadd.f32 %v49_v29, %v48_v27  ;;  %v45_v31 = vadd.f32 %v44_v28, %v43_v26 }
  0x8a   :  { %v51_v32 = vrot.slane %v50_v30, 1  ;;  %v53_v34 = vmul.f32 0.125, %v45_v31 }
  0x8c   :  { %v52_v33 = vadd.f32 %v51_v32, %v50_v30 }
  0x8e   :  { %v54_v35 = vmul.f32 0.125, %v52_v33 }
  0x90   :  { %v72_v36 = vsel %vm71_vm5, %v54_v35, %v53_v34 }
  0x91   :  { %193 = vmatmul.mubr.msk.f32.vlgmr.msra.gmra.mxu0 %vm38_vm2, %v72_v36 }
 0x151   :  { %v145_v38 = vpop.f32.mrf.mxu0 }
 0x152   :  { %v146_v39 = vadd.f32 %v167_v37, %v145_v38 }
 0x153   :  { %v194_v40 = vpop.f32.mrf.mxu0 }
 0x154   :  { %150 = vst.msk [vmem:[#allocation2] sm:$0x3] %vm149_vm6, %v146_v39 }
 0x155   :  { %209 = shalt.err (!%p206_p4)
}
 0x156   :  { %160 = dma.vmem_to_hbm [thread:$0]  %s158_s29, 32, %s279_s3, [#allocation3]  }
 0x157   :  { %218 = dma.done.wait [#allocation3], 32  }
 0x158   :  { %219 = vsyncadd [#allocation3], 4294967264 }
 0x159   :  { %164 = vsyncpa [#allocation3], 1 }

// kernel: tpu_custom_call.1
= control target key start
LH: loop header
LB: loop body
LE: loop exit
PB: predicated region body
PF: predicated region fallthrough
CT: control target
= control target key end

     0   :  { %v16_v0 = vlaneseq  ;;  %s276_s0 = inlined_call_operand.vmem [shape: s32[2,8], index: 0, kind: input, shape index: {}]   ;;  %s277_s1 = inlined_call_operand.vmem [shape: f32[50,2], index: 1, kind: input, shape index: {}]   ;;  %s278_s2 = inlined_call_operand.vmem [shape: f32[1,2], index: 2, kind: input, shape index: {}]   ;;  %s279_s3 = inlined_call_operand.hbm [shape: f32[2,2], index: 3, kind: output, shape index: {}]  }
   0x1   :  { %8 = vsyncpa [#allocation3], 0  ;;  %v220_v1 = vmov 0.0   ;;  %v15_v3 = vld [vmem:[%s276_s0] sm:$0x3]  ;;  %vm75_vm0 = vcmask 1041408  }
   0x2   :  { %178 = vmatprep.subr.mxu0 %v220_v1  ;;  %v19_v2 = vshrl.u32 %v16_v0, 7  ;;  %v61_v4 = vld [vmem:[%s277_s1 + $0x30] sm:$0x3]  ;;  %v60_v7 = vld [vmem:[%s277_s1 + $0x28] sm:$0xff]  ;;  %v59_v9 = vld [vmem:[%s277_s1 + $0x20] sm:$0xff]  ;;  %vm221_vm1 = vmmov 0  }
   0x3   :  { %179 = vmatpush3.msk.msra.mxu0 %vm75_vm0, %v61_v4  ;;  %v58_v11 = vld [vmem:[%s277_s1 + $0x18] sm:$0xff]  ;;  %v57_v12 = vld [vmem:[%s277_s1 + $0x10] sm:$0xff]  ;;  %v56_v13 = vld [vmem:[%s277_s1 + $0x8] sm:$0xff]  ;;  %192 = vmatprep.mubr.msk.f32.mxu0 %vm221_vm1, %v220_v1  ;;  %v17_v15 = vand.u32 127, %v16_v0  ;;  %vm38_vm2 = vcmask 408576   ;;  %vm71_vm5 = vcmask 1041409  }
   0x4   :  { %v20_v5 = vsub.s32 0, %v19_v2  ;;  %v27_v6 = vsub.s32 1, %v19_v2  ;;  %180 = vmatprep.subr.mxu0 %v220_v1  ;;  %v55_v14 = vld [vmem:[%s277_s1] sm:$0xff]  ;;  %s222_s28 = smov [#allocation2]   ;;  %vm149_vm6 = vcmask 9216  }
   0x5   :  { %181 = vmatpush3.msra.mxu0 %v60_v7  ;;  %v167_v37 = vld [vmem:[%s278_s2] ss:$0 sm:$0xff]  ;;  %s157_s29 = sshll.u32 %s222_s28, 4  ;;  %s158_s29 = int_to_ptr.vmem [resolvable:$true] %s157_s29 }
   0x6   :  { %v21_v8 = vrot.slane %v15_v3, %v20_v5  ;;  %182 = vmatprep.subr.mxu0 %v220_v1  ;;  %v28_v10 = vrot.slane %v15_v3, %v27_v6  ;;  %s198_s30 = scalar_lea.vmem %s158_s29, 32  ;;  %p203_p1 = scmp.lt.s32.totalorder %s158_s29, %s158_s29 }
   0x7   :  { %183 = vmatpush3.msra.mxu0 %v59_v9  ;;  %p199_p0 = scmp.ne.s32.totalorder %s158_s29, %s198_s30  ;;  %p204_p2 = scmp.lt.s32.totalorder %s198_s30, %s198_s30 }
   0x8   :  { %23 = vbcast.lane.b32.xlu0 %v21_v8, 256  ;;  %184 = vmatprep.subr.mxu0 %v220_v1 }
   0x9   :  { %185 = vmatpush3.msra.mxu0 %v58_v11  ;;  %p205_p3 = por %p204_p2, %p203_p1 }
   0xa   :  { %186 = vmatprep.subr.mxu0 %v220_v1 }
   0xb   :  { %187 = vmatpush3.msra.mxu0 %v57_v12  ;;  %p206_p4 = pnand %p205_p3, %p199_p0 }
   0xc   :  { %30 = vbcast.lane.b32.xlu0 %v28_v10, 256  ;;  %188 = vmatprep.subr.mxu0 %v220_v1 }
   0xd   :  { %189 = vmatpush3.msra.mxu0 %v56_v13 }
   0xe   :  { %190 = vmatprep.subr.mxu0 %v220_v1 }
   0xf   :  { %191 = vmatpush3.msra.mxu0 %v55_v14 }
  0x7a   :  { %v24_v16 = vpop.permute.xlu0 %23 }
  0x7b   :  { %vm32_vm3 = vcmp.eq.s32.totalorder %v24_v16, %v17_v15 }
  0x7c   :  { %v165_v17 = vsel %vm32_vm3, 1.0, %v220_v1 }
  0x7d   :  { %v39_v18 = vsel %vm38_vm2, %v165_v17, 0.0 }
  0x7e   :  { %v40_v19 = vrot.slane %v39_v18, 4  ;;  %v31_v20 = vpop.permute.xlu0 %30 }
  0x7f   :  { %vm33_vm4 = vcmp.eq.s32.totalorder %v31_v20, %v17_v15 }
  0x80   :  { %v41_v21 = vadd.f32 %v40_v19, %v39_v18  ;;  %v166_v22 = vsel %vm33_vm4, 1.0, %v220_v1 }
  0x81   :  { %v46_v23 = vsel %vm38_vm2, %v166_v22, 0.0 }
  0x82   :  { %v42_v24 = vrot.slane %v41_v21, 2  ;;  %v47_v25 = vrot.slane %v46_v23, 4 }
  0x84   :  { %v43_v26 = vadd.f32 %v42_v24, %v41_v21  ;;  %v48_v27 = vadd.f32 %v47_v25, %v46_v23 }
  0x86   :  { %v44_v28 = vrot.slane %v43_v26, 1  ;;  %v49_v29 = vrot.slane %v48_v27, 2 }
  0x88   :  { %v50_v30 = vadd.f32 %v49_v29, %v48_v27  ;;  %v45_v31 = vadd.f32 %v44_v28, %v43_v26 }
  0x8a   :  { %v51_v32 = vrot.slane %v50_v30, 1  ;;  %v53_v34 = vmul.f32 0.125, %v45_v31 }
  0x8c   :  { %v52_v33 = vadd.f32 %v51_v32, %v50_v30 }
  0x8e   :  { %v54_v35 = vmul.f32 0.125, %v52_v33 }
  0x90   :  { %v72_v36 = vsel %vm71_vm5, %v54_v35, %v53_v34 }
  0x91   :  { %193 = vmatmul.mubr.msk.f32.vlgmr.msra.gmra.mxu0 %vm38_vm2, %v72_v36 }
 0x151   :  { %v145_v38 = vpop.f32.mrf.mxu0 }
 0x152   :  { %v146_v39 = vadd.f32 %v167_v37, %v145_v38 }
 0x153   :  { %v194_v40 = vpop.f32.mrf.mxu0 }
 0x154   :  { %150 = vst.msk [vmem:[#allocation2] sm:$0x3] %vm149_vm6, %v146_v39 }
 0x155   :  { %209 = shalt.err (!%p206_p4)
}
 0x156   :  { %160 = dma.vmem_to_hbm [thread:$0]  %s158_s29, 32, %s279_s3, [#allocation3]  }
 0x157   :  { %218 = dma.done.wait [#allocation3], 32  }
 0x158   :  { %219 = vsyncadd [#allocation3], 4294967264 }
 0x159   :  { %164 = vsyncpa [#allocation3], 1 }

</bundles_post_ra>
